<compile_context>
chip_gen: v7x
topology: tpu7x:2x2x1
jax: 0.10.0
libtpu: 0.0.40
codegen_flags: <defaults>
</compile_context>

<pallas_src>
import jax
import jax.numpy as jnp
from jax.experimental import pallas as pl
from jax.experimental.pallas import tpu as pltpu


def _round_up(x: int, m: int) -> int:
    return (x + m - 1) // m * m


# ----------------------------- Pallas kernel -------------------------------

def _conv_gemm_kernel(w_ref, p_ref, o_ref):
    # w_ref: (Cout_pad, Kd_pad)  weights with bias folded in (resident in VMEM)
    # p_ref: (1, Kd_pad, tl)     im2col patch columns for this spatial tile
    # o_ref: (1, Cout_pad, tl)   output tile, already in NCHW-flat layout
    acc = jnp.dot(w_ref[...], p_ref[0], preferred_element_type=jnp.float32)
    o_ref[0] = acc.astype(o_ref.dtype)


def _conv_gemm(w2, patches, out_dtype, *, tl):
    Cp, Kd = w2.shape
    B, Kd2, Lp = patches.shape
    assert Kd == Kd2 and Lp % tl == 0

    in_item = jnp.dtype(patches.dtype).itemsize
    out_item = jnp.dtype(out_dtype).itemsize
    cost = pl.CostEstimate(
        flops=2 * B * Cp * Kd * Lp,
        transcendentals=0,
        bytes_accessed=(B * Kd * Lp * in_item          # patches (read once)
                        + Cp * Kd * in_item            # resident weights
                        + B * Cp * Lp * out_item),     # output (write once)
    )

    return pl.pallas_call(
        _conv_gemm_kernel,
        out_shape=jax.ShapeDtypeStruct((B, Cp, Lp), out_dtype),
        grid_spec=pltpu.PrefetchScalarGridSpec(
            num_scalar_prefetch=0,
            grid=(B, Lp // tl),
            in_specs=[
                pl.BlockSpec((Cp, Kd), lambda b, l: (0, 0)),       # resident W
                pl.BlockSpec((1, Kd, tl), lambda b, l: (b, 0, l)),  # patch tile
            ],
            out_specs=pl.BlockSpec((1, Cp, tl), lambda b, l: (b, 0, l)),
        ),
        compiler_params=pltpu.CompilerParams(
            dimension_semantics=("parallel", "parallel"),
            vmem_limit_bytes=48 * 1024 * 1024,
        ),
        cost_estimate=cost,
    )(w2, patches)


# ------------------------------ DownSample ---------------------------------

class DownSample:
    """JAX/Pallas port of the PyTorch DownSample module (Conv2d k3 s2 p1)."""

    def __init__(self, kernelSize=3, stride=2, in_channels=3, embed_dim=768,
                 key=None, mxu_dtype=jnp.bfloat16, out_dtype=jnp.bfloat16):
        if key is None:
            key = jax.random.PRNGKey(0)
        self.k = kernelSize
        self.stride = stride
        self.cin = in_channels
        self.cout = embed_dim
        self.mxu_dtype = jnp.dtype(mxu_dtype)
        self.out_dtype = jnp.dtype(out_dtype)

        kw, kb = jax.random.split(key)
        fan_in = in_channels * kernelSize * kernelSize
        bound = 1.0 / float(fan_in) ** 0.5
        # Same parameter layout as nn.Conv2d: weight (Cout, Cin, K, K), bias (Cout,)
        self.weight = jax.random.uniform(
            kw, (embed_dim, in_channels, kernelSize, kernelSize),
            dtype=jnp.float32, minval=-bound, maxval=bound)
        self.bias = jax.random.uniform(
            kb, (embed_dim,), dtype=jnp.float32, minval=-bound, maxval=bound)

        # ---- precompute the padded (Cout_pad, Kd_pad) GEMM weight ----------
        # Column order is (kh, kw, cin) followed by one "ones-tap" column that
        # holds the bias, so the bias add is folded into the GEMM.
        kdim = kernelSize * kernelSize * in_channels
        self._kd_full = kdim + 1                              # + bias column
        align = 16 if self.mxu_dtype.itemsize == 2 else 8
        self._kd_pad = _round_up(self._kd_full, align)
        self._cout_pad = _round_up(embed_dim, 16)             # sublane-friendly

        w2 = jnp.transpose(self.weight, (0, 2, 3, 1)).reshape(embed_dim, kdim)
        w2 = jnp.concatenate([w2, self.bias[:, None]], axis=1)   # bias column
        w2 = jnp.pad(w2, ((0, self._cout_pad - embed_dim),
                          (0, self._kd_pad - self._kd_full)))
        self._w2 = w2.astype(self.mxu_dtype)

    def __call__(self, x):
        # x: NCHW float32 (matches the PyTorch module's interface).
        B, Cin, H, W = x.shape
        assert Cin == self.cin
        K, S = self.k, self.stride
        pad = K // 2
        Ho = (H + 2 * pad - K) // S + 1
        Wo = (W + 2 * pad - K) // S + 1
        L = Ho * Wo

        # Cast early so every im2col intermediate is half-width (bf16 default).
        x = x.astype(self.mxu_dtype)

        # ---- im2col in transposed (Kd, spatial) layout, straight from NCHW --
        # TODO(synk): fuse this patch extraction into the kernel (halo'd NCHW
        #             input bands per spatial tile) to avoid the ~2.25x im2col
        #             materialization in HBM.
        x_pad = jnp.pad(x, ((0, 0), (0, 0), (pad, pad), (pad, pad)))
        taps = []
        for kh in range(K):
            for kw_ in range(K):
                taps.append(x_pad[:, :, kh:kh + S * Ho:S, kw_:kw_ + S * Wo:S])
        taps.append(jnp.ones((B, 1, Ho, Wo), dtype=self.mxu_dtype))  # bias tap
        patches = jnp.concatenate(taps, axis=1).reshape(B, self._kd_full, L)

        # ---- spatial tile (lane axis): multiple of 128, sized to VMEM budget
        in_item = self.mxu_dtype.itemsize
        out_item = self.out_dtype.itemsize
        per_col = self._kd_pad * in_item + self._cout_pad * out_item
        budget = 36 * 1024 * 1024                    # double-buffered blocks
        tl = min(4096,
                 (budget // (2 * per_col)) // 128 * 128,
                 _round_up(L, 128))
        tl = max(tl, 128)
        l_pad = _round_up(L, tl)

        patches = jnp.pad(patches, ((0, 0),
                                    (0, self._kd_pad - self._kd_full),
                                    (0, l_pad - L)))

        # ---- hot path: pipelined (Cout, Kd) @ (Kd, tl) GEMM on the MXU ------
        out_flat = _conv_gemm(self._w2, patches, self.out_dtype, tl=tl)

        # strip padding (identity slices whenever Cout / L are already aligned)
        out = out_flat[:, :self.cout, :L].reshape(B, self.cout, Ho, Wo)
        return out, Ho, Wo


# --------------------------------- main -------------------------------------

if __name__ == "__main__":
    key = jax.random.PRNGKey(0)
    k_in, k_param = jax.random.split(key)

    # Small shapes consistent with the module's forward.
    B, Cin, H, W = 2, 4, 16, 16
    embed_dim = 32
    x = jax.random.normal(k_in, (B, Cin, H, W), dtype=jnp.float32)

    # --- exact f32 path: numerically matches nn.Conv2d -----------------------
    mod_f32 = DownSample(kernelSize=3, stride=2, in_channels=Cin,
                         embed_dim=embed_dim, key=k_param,
                         mxu_dtype=jnp.float32, out_dtype=jnp.float32)
    out, Ho, Wo = mod_f32(x)
    out = jax.block_until_ready(out)

    ref = jax.lax.conv_general_dilated(
        x, mod_f32.weight, window_strides=(2, 2), padding=((1, 1), (1, 1)),
        dimension_numbers=("NCHW", "OIHW", "NCHW"))
    ref = ref + mod_f32.bias.reshape(1, embed_dim, 1, 1)

    assert out.shape == (B, embed_dim, H // 2, W // 2)
    assert Ho == H // 2 and Wo == W // 2
    assert jnp.allclose(out, ref, atol=1e-4, rtol=1e-4)

    # --- default production path: bf16 MXU inputs + bf16 output --------------
    mod = DownSample(kernelSize=3, stride=2, in_channels=Cin,
                     embed_dim=embed_dim, key=k_param)       # bf16 in / bf16 out
    out_bf, Ho2, Wo2 = mod(x)
    out_bf = jax.block_until_ready(out_bf)
    assert out_bf.dtype == jnp.bfloat16 and (Ho2, Wo2) == (Ho, Wo)

    # reference with the same bf16 rounding of inputs/weights/bias (f32 accum)
    ref_bf = jax.lax.conv_general_dilated(
        x.astype(jnp.bfloat16).astype(jnp.float32),
        mod.weight.astype(jnp.bfloat16).astype(jnp.float32),
        window_strides=(2, 2), padding=((1, 1), (1, 1)),
        dimension_numbers=("NCHW", "OIHW", "NCHW"))
    ref_bf = ref_bf + mod.bias.astype(jnp.bfloat16).astype(
        jnp.float32).reshape(1, embed_dim, 1, 1)
    assert jnp.allclose(out_bf.astype(jnp.float32), ref_bf, atol=3e-2, rtol=3e-2)

    print("KERNEL_OK")
</pallas_src>

<mosaic_0001>
module attributes {stable_mosaic.version = 11 : i64} {
  func.func @_conv_gemm_kernel(%arg0: i32, %arg1: i32, %arg2: memref<32x40xf32, #tpu.memory_space<vmem>>, %arg3: memref<1x40x128xf32, #tpu.memory_space<vmem>>, %arg4: memref<1x32x128xf32, #tpu.memory_space<vmem>>) attributes {dimension_semantics = [#tpu.dimension_semantics<parallel>, #tpu.dimension_semantics<parallel>], iteration_bounds = array<i64: 2, 1>, scalar_prefetch = 0 : i64, scratch_operands = 0 : i64, tpu.core_type = #tpu.core_type<tc>, window_params = [{pipeline_mode = #tpu.pipeline_mode<synchronous>, transform_indices = @transform_0, window_bounds = array<i64: 32, 40>}, {transform_indices = @transform_1, window_bounds = array<i64: 1, 40, 128>}, {transform_indices = @transform_2, window_bounds = array<i64: 1, 32, 128>}]} {
    %c0 = arith.constant 0 : index
    %c0_0 = arith.constant 0 : index
    %0 = vector.load %arg2[%c0, %c0_0] : memref<32x40xf32, #tpu.memory_space<vmem>>, vector<32x40xf32>
    %c0_1 = arith.constant 0 : index
    %c0_2 = arith.constant 0 : index
    %c0_3 = arith.constant 0 : index
    %1 = vector.load %arg3[%c0_1, %c0_2, %c0_3] : memref<1x40x128xf32, #tpu.memory_space<vmem>>, vector<1x40x128xf32>
    %2 = vector.shape_cast %1 : vector<1x40x128xf32> to vector<40x128xf32>
    %cst = arith.constant dense<0.000000e+00> : vector<32x128xf32>
    %3 = tpu.matmul %0, %2, %cst {dimension_numbers = #tpu.dot_dimension_numbers<[1], [0], [0], [1], [0, 0, 1, 1], [], []>} : vector<32x40xf32>, vector<40x128xf32>, vector<32x128xf32> -> vector<32x128xf32>
    %c0_4 = arith.constant 0 : index
    %c0_5 = arith.constant 0 : index
    %c0_6 = arith.constant 0 : index
    %4 = vector.load %arg4[%c0_4, %c0_5, %c0_6] : memref<1x32x128xf32, #tpu.memory_space<vmem>>, vector<1x32x128xf32>
    %5 = vector.shape_cast %4 : vector<1x32x128xf32> to vector<32x128xf32>
    %6 = vector.shape_cast %3 : vector<32x128xf32> to vector<1x32x128xf32>
    tpu.vector_store %arg4[%c0_4, %c0_5, %c0_6], %6 {strides = array<i32>} : memref<1x32x128xf32, #tpu.memory_space<vmem>>, vector<1x32x128xf32>,
    return
  }
  func.func @transform_0(%arg0: i32, %arg1: i32) -> (i32, i32) {
    %c0_i32 = arith.constant 0 : i32
    %c0_i32_0 = arith.constant 0 : i32
    %c0_i32_1 = arith.constant 0 : i32
    return %c0_i32, %c0_i32_0 : i32, i32
  }
  func.func @transform_1(%arg0: i32, %arg1: i32) -> (i32, i32, i32) {
    %c0_i32 = arith.constant 0 : i32
    %c0_i32_0 = arith.constant 0 : i32
    return %arg0, %c0_i32, %arg1 : i32, i32, i32
  }
  func.func @transform_2(%arg0: i32, %arg1: i32) -> (i32, i32, i32) {
    %c0_i32 = arith.constant 0 : i32
    %c0_i32_0 = arith.constant 0 : i32
    return %arg0, %c0_i32, %arg1 : i32, i32, i32
  }
}

</mosaic_0001>

<bundles_post_ra>
// kernel: tpu_custom_call.1
= control target key start
LH: loop header
LB: loop body
LE: loop exit
PB: predicated region body
PF: predicated region fallthrough
CT: control target
= control target key end

     0   :  { %7 = vsyncpa [#allocation3], 0  ;;  %s947_s0 = inlined_call_operand.hbm [shape: f32[32,40], index: 0, kind: input, shape index: {}]   ;;  %s948_s1 = inlined_call_operand.hbm [shape: f32[2,40,128], index: 1, kind: input, shape index: {}]   ;;  %s949_s2 = inlined_call_operand.hbm [shape: f32[2,32,128], index: 2, kind: output, shape index: {}]  }
   0x1   :  { %8 = vsyncpa [#allocation6], 0 }
   0x2   :  { %10 = vsyncpa [#allocation6 + $0x1], 0 }
   0x3   :  { %11 = vsyncpa [#allocation4], 0 }
   0x4   :  { %13 = vsyncpa [#allocation4 + $0x1], 0  ;;  %s723_s9 = smov 0   ;;  %s725_s10 = smov 0  }
   0x5   :  { %s727_s11 = smov 0   ;;  %s729_s12 = smov 0  }
   0x6   :  { %s731_s13 = smov 0   ;;  %s733_s14 = smov 0  }
   0x7 LB: > { %s417_s15 = sadd.s32 4294967295, %s699_s14   ;;  %s418_s16 = sadd.s32 4294967294, %s699_s14   ;;  %s699_s14 = sphi %s733_s14, %s19_s14   ;;  %s695_s13 = sphi %s731_s13, %s972_s13   ;;  %s691_s12 = sphi %s729_s12, %s971_s12   ;;  %s687_s11 = sphi %s727_s11, %s970_s11   ;;  %s683_s10 = sphi %s725_s10, %s969_s10   ;;  %s679_s9 = sphi %s723_s9, %s968_s9  }
   0x8   : > { %p74_p0 = scmp.ne.s32.totalorder %s683_s10, %s679_s9  ;;  %p757_p1 = scmp.eq.s32.totalorder %s417_s15, 0 }
   0x9   : > { %p761_p2 = scmp.eq.s32.totalorder %s417_s15, 1  ;;  %p106_p3 = scmp.eq.s32.totalorder %s418_s16, 1 }
   0xa   : > { %s954_s17 = scalar_select %p757_p1, 1, 0 }
   0xb   : > { %s955_s18 = scalar_select %p761_p2, 1, 0 }
   0xc   : > { %p767_p4 = por %p757_p1, %p74_p0  ;;  %p419_p5 = scmp.ge.s32.totalorder %s699_s14, 1 }
   0xd   : > { %p772_p6 = por %p106_p3, %p74_p0  ;;  %p113_p7 = scmp.lt.s32.totalorder %s699_s14, 3 }
   0xe   : > { %s956_s19 = scalar_select %p767_p4, 1, 0 }
   0xf   : > { %s957_s20 = scalar_select %p772_p6, 1, 0 }
  0x10   : > { %p777_p8 = pnand %p419_p5, %p113_p7  ;;  %s701_s22 = smov [#allocation2]  }
  0x11   : > { %s125_s23 = sshll.u32 %s701_s22, 4  ;;  %s31_s25 = sadd.s32 1, %s695_s13  ;;  %s126_s23 = int_to_ptr.vmem [resolvable:$true] %s125_s23 }
  0x12   : > { %s958_s21 = scalar_select %p777_p8, 1, 0 }
  0x13   : > { %p486_p9 = pneg %p777_p8  ;;  %s555_s28 = scalar_lea.hbm %s947_s0, 512 }
  0x14   : > { %p556_p12 = scmp.ne.s32.totalorder %s947_s0, %s555_s28  ;;  %p562_p5 = scmp.lt.u32.totalorder %s555_s28, %s947_s0 }
  0x15   : > { %p786_p11 = pnand %p486_p9, %p757_p1 }
  0x17   : > { %p557_p13 = pneg %p786_p11 }
  0x19   : > { %p558_p0 = pnand %p557_p13, %p556_p12 }
  0x1b   : > { %p559_p3 = pneg %p558_p0 }
  0x1d   : > { %p564_p7 = pnand %p562_p5, %p559_p3 }
  0x1f   : > { %567 = shalt.err (!%p564_p7)
}
  0x20   : > { %s568_s5 = scalar_lea.vmem %s126_s23, 512  ;;  %p576_p4 = scmp.lt.s32.totalorder %s126_s23, %s126_s23 }
  0x21   : > { %p569_p9 = scmp.ne.s32.totalorder %s126_s23, %s568_s5  ;;  %p577_p1 = scmp.lt.s32.totalorder %s568_s5, %s568_s5 }
  0x23   : > { %p571_p10 = pnand %p569_p9, %p557_p13  ;;  %p578_p8 = por %p577_p1, %p576_p4 }
  0x25   : > { %p572_p6 = pneg %p571_p10 }
  0x27   : > { %p579_p2 = pnand %p578_p8, %p572_p6 }
  0x29   : > { %582 = shalt.err (!%p579_p2)
}
  0x2a   : > { %s702_s6 = smov 128   ;;  %s703_s7 = smov 8  }
  0x2b   : > { %489 = dma.hbm_to_vmem [thread:$0]  (!%p786_p11), %s947_s0, 512, %s126_s23, [#allocation3], %s702_s6, %s702_s6, %s703_s7  }
  0x2c   : > { %p33_p1 = scmp.ge.s32.totalorder %s31_s25, 2  ;;  %s61_s16 = sadd.s32 1, %s687_s11 }
  0x2d   : > { %p68_p2 = scmp.ne.s32.totalorder %s687_s11, %s683_s10  ;;  %p69_p4 = scmp.eq.s32.totalorder %s699_s14, 0 }
  0x2e   : > { %s974_s25 = smov (%p33_p1, %s31_s25), 0  ;;  %p960_p8 = scmp.ne.s32.totalorder %s955_s18, 0 }
  0x2f   : > { %p70_p6 = por %p69_p4, %p68_p2  ;;  %s56_s24 = ssub.s32 %s695_s13, %s974_s25 }
  0x30   : > { %p818_p10 = por %p960_p8, %p68_p2  ;;  %p499_p12 = scmp.lt.s32.totalorder %s699_s14, 2 }
  0x31   : > { %p59_p13 = scmp.eq.s32.totalorder %s56_s24, 0  ;;  %s139_s26 = sand.u32 1, %s687_s11  }
  0x32   : > { %s475_s27 = smul.u32 40, %s139_s26  ;;  %p830_p11 = pnand %p499_p12, %p70_p6 }
  0x33   : > { %s827_s28 = scalar_select %p59_p13, %s687_s11, %s61_s16  }
  0x34   : > { %s476_s23 = smul.u32 640, %s695_s13  ;;  %s143_s29 = scalar_lea.vmem [#allocation5], %s475_s27 }
  0x35   : > { %s151_s30 = sshll.u32 %s143_s29, 4  ;;  %s841_s8 = scalar_lea.sflag [#allocation6], %s139_s26  ;;  %s839_s30 = int_to_ptr.vmem [resolvable:$true] %s151_s30 }
  0x36   : > { %s837_s5 = scalar_lea.hbm %s948_s1, %s476_s23  ;;  %p585_p3 = pneg %p830_p11 }
  0x37   : > { %s583_s15 = scalar_lea.hbm %s837_s5, 640  ;;  %s588_s27 = scalar_lea.hbm %s948_s1, 1280 }
  0x38   : > { %p584_p0 = scmp.ne.s32.totalorder %s837_s5, %s583_s15  ;;  %p589_p9 = scmp.lt.u32.totalorder %s837_s5, %s948_s1 }
  0x39   : > { %p590_p1 = scmp.lt.u32.totalorder %s588_s27, %s583_s15  ;;  %p592_p4 = scmp.lt.u32.totalorder %s583_s15, %s837_s5 }
  0x3a   : > { %p586_p5 = pnand %p585_p3, %p584_p0 }
  0x3b   : > { %p591_p2 = por %p590_p1, %p589_p9 }
  0x3c   : > { %p587_p7 = pneg %p586_p5 }
  0x3d   : > { %p593_p6 = por %p592_p4, %p591_p2 }
  0x3f   : > { %p594_p8 = pnand %p593_p6, %p587_p7 }
  0x41   : > { %597 = shalt.err (!%p594_p8)
}
  0x42   : > { %s598_s26 = scalar_lea.vmem %s839_s30, 640  ;;  %s704_s4 = smov [#allocation5]  }
  0x43   : > { %p599_p12 = scmp.ne.s32.totalorder %s839_s30, %s598_s26  ;;  %s603_s18 = sshll.u32 %s704_s4, 4  ;;  %s604_s18 = int_to_ptr.vmem [resolvable:$false] %s603_s18 }
  0x44   : > { %s605_s16 = scalar_lea.vmem %s604_s18, 1280  ;;  %p606_p5 = scmp.lt.s32.totalorder %s839_s30, %s604_s18 }
  0x45   : > { %p601_p13 = pnand %p599_p12, %p585_p3  ;;  %p607_p9 = scmp.lt.s32.totalorder %s605_s16, %s598_s26 }
  0x47   : > { %p602_p0 = pneg %p601_p13  ;;  %p608_p1 = por %p607_p9, %p606_p5 }
  0x49   : > { %p609_p2 = pnand %p608_p1, %p602_p0 }
  0x4b   : > { %612 = shalt.err (!%p609_p2)
}
  0x4c   : > { %493 = dma.hbm_to_vmem [thread:$0]  (!%p830_p11), %s837_s5, 640, %s839_s30, %s841_s8, %s702_s6, %s702_s6, %s703_s7  }
  0x4d   : > { %p963_p3 = scmp.ne.s32.totalorder %s958_s21, 0 }
  0x4e   : > { %p964_p7 = scmp.ne.s32.totalorder (!%p963_p3), %s954_s17, 0 }
  0x4f   : > { %163 = sbr.rel (%p963_p3) target bundleno = 334 (0x14e), region = 28 }
  0x56   : > { %666 = dma.done.wait (%p964_p7), [#allocation3], 512  }
  0x57   : > { %668 = vsyncadd (%p964_p7), [#allocation3], 4294966784  ;;  %s879_s15 = sand.u32 1, %s683_s10   ;;  %p965_p4 = scmp.ne.s32.totalorder %s956_s19, 0 }
  0x58   : > { %s477_s3 = smul.u32 40, %s879_s15  ;;  %s170_s24 = scalar_lea.sflag [#allocation6], %s879_s15 }
  0x5a   : > { %s173_s27 = scalar_lea.vmem [#allocation5], %s477_s3 }
  0x5b   : > { %670 = dma.done.wait (%p965_p4), %s170_s24, 640  }
  0x5c   : > { %672 = vsyncadd (%p965_p4), %s170_s24, 4294966656  ;;  %vm203_vm0 = vcmask 326656   ;;  %v198_v0 = vld [vmem:[%s173_s27] sm:$0xff]  ;;  %v199_v1 = vld [vmem:[%s173_s27 + $0x8] sm:$0xff]  ;;  %s425_s17 = sshll.u32 %s879_s15, 5  ;;  %s435_s6 = sshll.u32 %s691_s12, 9 }
  0x5d   : > { %v200_v2 = vld [vmem:[%s173_s27 + $0x10] sm:$0xff]  ;;  %v461_v3 = vpack.c.bf16 %v199_v1, %v198_v0  ;;  %v201_v4 = vld [vmem:[%s173_s27 + $0x18] sm:$0xff]  ;;  %v202_v8 = vld [vmem:[%s173_s27 + $0x20] sm:$0xff]  ;;  %s193_s19 = scalar_lea.vmem [#allocation7], %s425_s17  ;;  %s898_s5 = scalar_lea.hbm %s949_s2, %s435_s6 }
  0x5e   : > { %v194_v5 = vld [vmem:[#allocation2] sm:$0xff]  ;;  %v465_v6 = vpack.c.bf16 %v201_v4, %v200_v2  ;;  %v196_v7 = vld [vmem:[#allocation2 + $0x10] sm:$0xff]  ;;  %v195_v9 = vld [vmem:[#allocation2 + $0x8] sm:$0xff]  ;;  %s320_s21 = sshll.u32 %s193_s19, 4  ;;  %s306_s8 = scalar_lea.sflag [#allocation4], %s879_s15  ;;  %s893_s21 = int_to_ptr.vmem [resolvable:$true] %s320_s21 }
  0x5f   : > { %455 = vmatprep.mubr.msk.f32.mxu0 %vm203_vm0, %v194_v5  ;;  %462 = vmatprep.subr.bf16.mxu0 %v461_v3  ;;  %v197_v10 = vld [vmem:[#allocation2 + $0x18] sm:$0xff]  ;;  %s613_s12 = scalar_lea.vmem %s893_s21, 512  ;;  %s705_s23 = smov [#allocation7]  }
  0x60   : > { %469 = vmatprep.subr.bf16.mxu1 %v461_v3  ;;  %464 = vmatpush3.bf16.msra.mxu0 %v461_v3  ;;  %p614_p11 = scmp.ne.s32.totalorder %s893_s21, %s613_s12  ;;  %s617_s29 = sshll.u32 %s705_s23, 4  ;;  %s618_s29 = int_to_ptr.vmem [resolvable:$false] %s617_s29 }
  0x61   : > { %472 = vmatpush3.bf16.msra.mxu1 %v461_v3  ;;  %466 = vmatprep.subr.bf16.mxu0 %v465_v6  ;;  %s619_s26 = scalar_lea.vmem %s618_s29, 1024  ;;  %p620_p12 = scmp.lt.s32.totalorder %s893_s21, %s618_s29 }
  0x62   : > { %470 = vmatprep.subr.bf16.mxu1 %v465_v6  ;;  %458 = vmatprep.mubr.msk.f32.mxu1 %vm203_vm0, %v196_v7  ;;  %p615_p6 = pnand %p614_p11, %p818_p10  ;;  %p621_p13 = scmp.lt.s32.totalorder %s619_s26, %s613_s12 }
  0x64   : > { %468 = vmatpush3.bf16.msra.mxu0 %v465_v6  ;;  %p616_p8 = pneg %p615_p6  ;;  %p622_p0 = por %p621_p13, %p620_p12 }
  0x65   : > { %473 = vmatpush3.bf16.msra.mxu1 %v465_v6  ;;  %453 = vmatprep.subr.mxu0 %v202_v8 }
  0x66   : > { %471 = vmatprep.subr.mxu1 %v202_v8  ;;  %p623_p5 = pnand %p622_p0, %p616_p8 }
  0x68   : > { %454 = vmatpush3.msra.mxu0 %v202_v8 }
  0x69   : > { %474 = vmatpush3.msra.mxu1 %v202_v8  ;;  %456 = vmatmul.mubr.msk.f32.vlgmr.msra.gmra.mrb[0].mxu0 %vm203_vm0, %v195_v9 }
  0x6a   : > { %459 = vmatmul.mubr.msk.f32.vlgmr.msra.gmra.mrb[0].mxu1 %vm203_vm0, %v197_v10 }
 0x13c   : > { %v457_v11 = vpop.f32.mrb[0].mxu0 }
 0x13d   : > { %v460_v12 = vpop.f32.mrb[0].mxu1  ;;  %302 = vst [vmem:[%s193_s19 + $0x8] sm:$0xff] %v457_v11  ;;  %v282_v13 = vpop.f32.mrb[1].mxu0 }
 0x13e   : > { %304 = vst [vmem:[%s193_s19 + $0x18] sm:$0xff] %v460_v12  ;;  %v292_v14 = vpop.f32.mrb[1].mxu1  ;;  %301 = vst [vmem:[%s193_s19] sm:$0xff] %v282_v13 }
 0x13f   : > { %303 = vst [vmem:[%s193_s19 + $0x10] sm:$0xff] %v292_v14 }
 0x140   : > { %626 = shalt.err (!%p623_p5)
}
 0x141   : > { %s627_s4 = scalar_lea.hbm %s898_s5, 512  ;;  %s631_s3 = scalar_lea.hbm %s949_s2, 1024 }
 0x142   : > { %p628_p9 = scmp.ne.s32.totalorder %s898_s5, %s627_s4  ;;  %p632_p3 = scmp.lt.u32.totalorder %s898_s5, %s949_s2 }
 0x143   : > { %p633_p7 = scmp.lt.u32.totalorder %s631_s3, %s627_s4  ;;  %p635_p11 = scmp.lt.u32.totalorder %s627_s4, %s898_s5 }
 0x144   : > { %p629_p1 = pnand %p628_p9, %p818_p10 }
 0x145   : > { %p634_p4 = por %p633_p7, %p632_p3 }
 0x146   : > { %p630_p2 = pneg %p629_p1 }
 0x147   : > { %p636_p6 = por %p635_p11, %p634_p4 }
 0x149   : > { %p637_p8 = pnand %p636_p6, %p630_p2 }
 0x14b   : > { %640 = shalt.err (!%p637_p8)
}
 0x14c   : > { %s706_s17 = smov 128   ;;  %s707_s19 = smov 8  }
 0x14d   : > { %484 = dma.vmem_to_hbm [thread:$0]  (%p818_p10), %s893_s21, 512, %s898_s5, %s306_s8, %s706_s17, %s706_s17, %s707_s19  }
 0x14e PF: > { %s335_s6 = sand.u32 1, %s679_s9   ;;  %p966_p12 = scmp.ne.s32.totalorder %s957_s20, 0 }
 0x14f   : > { %p967_p13 = scmp.ge.s32.totalorder %s699_s14, 2  ;;  %s336_s7 = scalar_lea.sflag [#allocation4], %s335_s6 }
 0x151   : > { %p495_p0 = pnand %p967_p13, %p966_p12 }
 0x153   : > { %674 = dma.done.wait (!%p495_p0), %s336_s7, 512  }
 0x154   : > { %676 = vsyncadd (!%p495_p0), %s336_s7, 4294966784  ;;  %s19_s14 = sadd.s32 1, %s699_s14   ;;  %s968_s9 = smov %s683_s10 }
 0x155   : > { %p16_p5 = scmp.ge.s32.totalorder %s19_s14, 4   ;;  %s969_s10 = smov %s687_s11 }
 0x156   : > { %s970_s11 = smov %s827_s28  ;;  %s971_s12 = smov %s695_s13 }
 0x157   : > { %s972_s13 = smov %s974_s25  ;;  %18 = sbr.rel (!%p16_p5) target bundleno = 7 (0x7), region = 78 }
 0x15e   :  { %341 = vsyncpa [#allocation3], 1 }
 0x15f   :  { %343 = vsyncpa [#allocation3 + $0x1], 1 }
 0x160   :  { %344 = vsyncpa [#allocation6], 1 }
 0x161   :  { %346 = vsyncpa [#allocation6 + $0x1], 1 }
 0x162   :  { %347 = vsyncpa [#allocation4], 1 }
 0x163   :  { %349 = vsyncpa [#allocation4 + $0x1], 1 }

</bundles_post_ra>
